<compile_context>
chip_gen: v5e
topology: v5e:2x2
jax: 0.10.0
libtpu: 0.0.40
codegen_flags: <defaults>
</compile_context>

<pallas_src>
import jax
import jax.numpy as jnp
from jax.experimental import pallas as pl
from jax.experimental.pallas import tpu as pltpu


# ------------------------------ Pallas kernel ------------------------------ #

def _add_pe_kernel(x_ref, pe_ref, o_ref):
    # x_ref: (Bb, ts, D), pe_ref: (ts, D) -> broadcast-add over the batch-block axis.
    # Add directly in x's dtype (pe already cast on the host); the kernel is
    # DMA-bound so there is no benefit to an f32 upcast, and bf16 halves traffic.
    o_ref[...] = (x_ref[...] + pe_ref[...][None, :, :]).astype(o_ref.dtype)


# ------------------------------ tile sizing -------------------------------- #

def _round_down_mult8(v):
    return max(8, (int(v) // 8) * 8)


def _pick_seq_tile(S, D, itemsize, budget):
    # Working set per grid step ~= (4*Bb + 2) * ts * D * itemsize
    # (double-buffered x-in and out, double-buffered pe).  Size ts assuming Bb=1.
    ts_cap = _round_down_mult8(budget // (6 * D * itemsize))
    if S <= ts_cap:
        return S                         # block == full dim: always legal
    # Prefer a multiple-of-8 divisor of S so every tile is full and unmasked.
    t = ts_cap
    while t >= 8:
        if S % t == 0:
            return t
        t -= 8
    return ts_cap                        # fallback: ragged last tile (edge-masked)


def _pick_batch_block(B, ts, D, itemsize, budget, target_block_bytes=1 << 20):
    row_bytes = ts * D * itemsize
    bb_target = max(1, target_block_bytes // row_bytes)      # ~0.5-2 MiB x/out blocks
    bb_vmem = max(1, (budget // row_bytes - 2) // 4)          # (4*Bb+2)*row <= budget
    bb = int(min(B, bb_target, bb_vmem))
    while bb > 1 and B % bb != 0:                             # keep full batch blocks
        bb -= 1
    return bb


# --------------------------------- wrapper ---------------------------------- #

def positional_encoding_forward(x, pe, *, vmem_budget_bytes=16 << 20):
    """x: [B, S, D] activations; pe: [max_len, D] sinusoidal table (max_len >= S).

    The 16 MiB default working-set budget fits every TPU generation (v5e 16 MiB
    scoped default / 128 MiB physical, v6e 32/128, v7x 32/64); vmem_limit_bytes is
    then set explicitly from the chosen tiling so the choice is deterministic.
    """
    B, S, D = x.shape
    max_len, d_pe = pe.shape
    assert d_pe == D, "pe feature dim must match x"
    assert S <= max_len, "sequence length exceeds positional-encoding table"

    out_shape = (B, S, D)

    # Slice pe to exactly S rows (minimal HBM read, no edge-tile OOB reliance) and
    # store/read it in x's dtype (bf16 inputs -> bf16 pe traffic).
    pe = pe[:S].astype(x.dtype)

    # Lane-dense packing for small d_model: fold k consecutive seq rows into one
    # row of k*D (=128-multiple) lanes so every store is an unmasked full-lane vst.
    if D < 128 and 128 % D == 0:
        k = 128 // D
        if S % k == 0:
            S, D = S // k, D * k
            x = x.reshape(B, S, D)
            pe = pe.reshape(S, D)

    itemsize = jnp.dtype(x.dtype).itemsize
    ts = _pick_seq_tile(S, D, itemsize, vmem_budget_bytes)
    bb = _pick_batch_block(B, ts, D, itemsize, vmem_budget_bytes)

    n_seq = pl.cdiv(S, ts)
    n_bat = pl.cdiv(B, bb)

    # v7x has 2 TensorCores sharing the chip: make sure a "parallel" axis has at
    # least 2 blocks when there is anything to split (harmless on v5e/v6e).
    if n_seq == 1 and n_bat == 1:
        if B >= 2:
            bb = (B + 1) // 2
            n_bat = pl.cdiv(B, bb)
        elif ts % 16 == 0:
            ts //= 2
            n_seq = pl.cdiv(S, ts)

    # Explicit VMEM limit matching the tiling (+25% and 4 MiB headroom for Mosaic
    # internals), instead of relying on per-generation scoped defaults.
    working_set = (4 * bb + 2) * ts * D * itemsize
    vmem_limit = int(max(working_set + working_set // 4 + (4 << 20), 16 << 20))

    out = pl.pallas_call(
        _add_pe_kernel,
        out_shape=jax.ShapeDtypeStruct((B, S, D), x.dtype),
        # Batch innermost: pe's block index only depends on the seq tile, so the
        # pe tile is revisited (not re-DMA'd) across the whole inner batch sweep.
        grid=(n_seq, n_bat),
        in_specs=[
            pl.BlockSpec((bb, ts, D), lambda s, b: (b, s, 0)),   # x
            pl.BlockSpec((ts, D), lambda s, b: (s, 0)),          # pe (seq tile only)
        ],
        out_specs=pl.BlockSpec((bb, ts, D), lambda s, b: (b, s, 0)),
        compiler_params=pltpu.CompilerParams(
            dimension_semantics=("parallel", "parallel"),
            vmem_limit_bytes=vmem_limit),
    )(x, pe)

    return out.reshape(out_shape)


# --------------------- host-side buffer (module __init__) ------------------- #

def sinusoidal_pe_table(max_len, d_model, dtype=jnp.float32):
    """Exact equivalent of the PyTorch register_buffer construction."""
    assert d_model % 2 == 0, "d_model must be even (as required by the PyTorch module)"
    pos = jnp.arange(max_len, dtype=jnp.float32)[:, None]                      # (L, 1)
    div_term = jnp.exp(jnp.arange(0, d_model, 2, dtype=jnp.float32)
                       * -(jnp.log(jnp.float32(10000.0)) / d_model))           # (D/2,)
    ang = pos * div_term                                                       # (L, D/2)
    pe = jnp.zeros((max_len, d_model), jnp.float32)
    pe = pe.at[:, 0::2].set(jnp.sin(ang))
    pe = pe.at[:, 1::2].set(jnp.cos(ang))
    return pe.astype(dtype)


# --------------------------- pure-JAX reference ----------------------------- #

def _ref_forward(x, pe):
    S = x.shape[1]
    return x + pe[None, :S, :].astype(x.dtype)


# ----------------------------------- main ----------------------------------- #

if __name__ == "__main__":
    key = jax.random.PRNGKey(0)

    # 1) Primary small test matching the module (d_model=32 -> lane-dense k=4 packing).
    B, S, D, MAX_LEN = 2, 8, 32, 64
    x = jax.random.normal(key, (B, S, D), jnp.float32)
    pe = sinusoidal_pe_table(MAX_LEN, D)
    out = jax.block_until_ready(positional_encoding_forward(x, pe))
    ref = _ref_forward(x, pe)
    assert out.shape == (B, S, D)
    assert bool(jnp.all(jnp.isfinite(out)))
    assert bool(jnp.allclose(out, ref, atol=1e-6, rtol=1e-6)), \
        float(jnp.max(jnp.abs(out - ref)))

    # 2) Batch-blocked path (Bb > 1), D >= 128 (no packing, lane-dense natively).
    x2 = jax.random.normal(jax.random.PRNGKey(1), (8, 128, 512), jnp.float32)
    pe2 = sinusoidal_pe_table(256, 512)
    out2 = jax.block_until_ready(positional_encoding_forward(x2, pe2))
    assert bool(jnp.allclose(out2, _ref_forward(x2, pe2), atol=1e-6, rtol=1e-6))

    # 3) Multi-seq-tile pipelined path (forced via a small VMEM budget).
    x3 = jax.random.normal(jax.random.PRNGKey(2), (2, 1024, 256), jnp.float32)
    pe3 = sinusoidal_pe_table(1024, 256)
    out3 = jax.block_until_ready(
        positional_encoding_forward(x3, pe3, vmem_budget_bytes=1 << 20))
    assert bool(jnp.allclose(out3, _ref_forward(x3, pe3), atol=1e-6, rtol=1e-6))

    # 4) bf16 path: pe read/added in bf16 (no f32 upcast), d_model=64 packing (k=2).
    x4 = jax.random.normal(jax.random.PRNGKey(3), (2, 8, 64), jnp.bfloat16)
    pe4 = sinusoidal_pe_table(16, 64)
    out4 = jax.block_until_ready(positional_encoding_forward(x4, pe4))
    assert bool(jnp.allclose(out4.astype(jnp.float32),
                             _ref_forward(x4, pe4).astype(jnp.float32),
                             atol=1e-2, rtol=1e-2))

    print("KERNEL_OK")
</pallas_src>

<mosaic_0001>
module attributes {stable_mosaic.version = 11 : i64} {
  func.func @_add_pe_kernel(%arg0: i32, %arg1: i32, %arg2: memref<1x2x128xf32, #tpu.memory_space<vmem>>, %arg3: memref<2x128xf32, #tpu.memory_space<vmem>>, %arg4: memref<1x2x128xf32, #tpu.memory_space<vmem>>) attributes {dimension_semantics = [#tpu.dimension_semantics<parallel>, #tpu.dimension_semantics<parallel>], iteration_bounds = array<i64: 1, 2>, scalar_prefetch = 0 : i64, scratch_operands = 0 : i64, tpu.core_type = #tpu.core_type<tc>, window_params = [{transform_indices = @transform_0, window_bounds = array<i64: 1, 2, 128>}, {transform_indices = @transform_1, window_bounds = array<i64: 2, 128>}, {transform_indices = @transform_2, window_bounds = array<i64: 1, 2, 128>}]} {
    %c0 = arith.constant 0 : index
    %c0_0 = arith.constant 0 : index
    %c0_1 = arith.constant 0 : index
    %0 = vector.load %arg2[%c0, %c0_0, %c0_1] : memref<1x2x128xf32, #tpu.memory_space<vmem>>, vector<1x2x128xf32>
    %c0_2 = arith.constant 0 : index
    %c0_3 = arith.constant 0 : index
    %1 = vector.load %arg3[%c0_2, %c0_3] : memref<2x128xf32, #tpu.memory_space<vmem>>, vector<2x128xf32>
    %2 = vector.shape_cast %1 : vector<2x128xf32> to vector<1x2x128xf32>
    %3 = arith.addf %0, %2 : vector<1x2x128xf32>
    %c0_4 = arith.constant 0 : index
    %c0_5 = arith.constant 0 : index
    %c0_6 = arith.constant 0 : index
    %4 = vector.load %arg4[%c0_4, %c0_5, %c0_6] : memref<1x2x128xf32, #tpu.memory_space<vmem>>, vector<1x2x128xf32>
    tpu.vector_store %arg4[%c0_4, %c0_5, %c0_6], %3 {strides = array<i32>} : memref<1x2x128xf32, #tpu.memory_space<vmem>>, vector<1x2x128xf32>,
    return
  }
  func.func @transform_0(%arg0: i32, %arg1: i32) -> (i32, i32, i32) {
    %c0_i32 = arith.constant 0 : i32
    %c0_i32_0 = arith.constant 0 : i32
    return %arg1, %arg0, %c0_i32 : i32, i32, i32
  }
  func.func @transform_1(%arg0: i32, %arg1: i32) -> (i32, i32) {
    %c0_i32 = arith.constant 0 : i32
    %c0_i32_0 = arith.constant 0 : i32
    return %arg0, %c0_i32 : i32, i32
  }
  func.func @transform_2(%arg0: i32, %arg1: i32) -> (i32, i32, i32) {
    %c0_i32 = arith.constant 0 : i32
    %c0_i32_0 = arith.constant 0 : i32
    return %arg1, %arg0, %c0_i32 : i32, i32, i32
  }
}

</mosaic_0001>

<bundles_post_ra>
// kernel: tpu_custom_call.1
= control target key start
LH: loop header
LB: loop body
LE: loop exit
PB: predicated region body
PF: predicated region fallthrough
CT: control target
= control target key end

     0   :  { %7 = vsyncpa [#allocation3], 0  ;;  %s714_s0 = inlined_call_operand.hbm [shape: f32[2,2,128], index: 0, kind: input, shape index: {}]   ;;  %s715_s1 = inlined_call_operand.hbm [shape: f32[2,128], index: 1, kind: input, shape index: {}]   ;;  %s716_s2 = inlined_call_operand.hbm [shape: f32[2,2,128], index: 2, kind: output, shape index: {}]  }
   0x1   :  { %9 = vsyncpa [#allocation3 + $0x1], 0 }
   0x2   :  { %10 = vsyncpa [#allocation6], 0 }
   0x3   :  { %11 = vsyncpa [#allocation4], 0 }
   0x4   :  { %13 = vsyncpa [#allocation4 + $0x1], 0  ;;  %s565_s9 = smov 0   ;;  %s567_s10 = smov 0  }
   0x5   :  { %s569_s11 = smov 0   ;;  %s571_s12 = smov 0  }
   0x6   :  { %s573_s13 = smov 0   ;;  %s575_s14 = smov 0  }
   0x7 LB: > { %s313_s15 = sadd.s32 4294967295, %s547_s14   ;;  %s314_s16 = sadd.s32 4294967294, %s547_s14   ;;  %s547_s14 = sphi %s575_s14, %s19_s14   ;;  %s543_s13 = sphi %s573_s13, %s728_s13   ;;  %s539_s12 = sphi %s571_s12, %s727_s12   ;;  %s535_s11 = sphi %s569_s11, %s726_s11   ;;  %s531_s10 = sphi %s567_s10, %s725_s10   ;;  %s527_s9 = sphi %s565_s9, %s724_s9  }
   0x8   : > { %p53_p0 = scmp.ne.s32.totalorder %s531_s10, %s527_s9  ;;  %p599_p1 = scmp.eq.s32.totalorder %s313_s15, 0 }
   0x9   : > { %p603_p2 = scmp.eq.s32.totalorder %s313_s15, 1  ;;  %p111_p3 = scmp.eq.s32.totalorder %s314_s16, 1 }
   0xa   : > { %p609_p4 = por %p599_p1, %p53_p0  ;;  %p315_p5 = scmp.ge.s32.totalorder %s547_s14, 1 }
   0xb   : > { %p614_p6 = por %p111_p3, %p53_p0  ;;  %p118_p7 = scmp.lt.s32.totalorder %s547_s14, 3 }
   0xc   : > { %s132_s23 = sshll.u32 %s715_s1, 4  ;;  %p317_p9 = scmp.ge.s32.totalorder %s547_s14, 2  ;;  %s133_s23 = int_to_ptr.hbm [resolvable:$true] %s132_s23 }
   0xd   : > { %p622_p8 = pnand %p315_p5, %p118_p7  ;;  %s549_s25 = smov [#allocation5]  }
   0xe   : > { %s134_s26 = sshll.u32 %s549_s25, 4  ;;  %s28_s27 = sadd.s32 1, %s543_s13  ;;  %s135_s26 = int_to_ptr.vmem [resolvable:$true] %s134_s26 }
   0xf   : > { %p336_p10 = pneg %p622_p8  ;;  %p29_p12 = scmp.ge.s32.totalorder %s28_s27, 2 }
  0x10   : > { %s40_s28 = sadd.s32 1, %s535_s11  ;;  %p47_p13 = scmp.ne.s32.totalorder %s535_s11, %s531_s10 }
  0x11   : > { %p337_p11 = pnand %p336_p10, %p599_p1  ;;  %p48_p0 = scmp.eq.s32.totalorder %s547_s14, 0 }
  0x12   : > { %s730_s27 = smov (%p29_p12, %s28_s27), 0  ;;  %p644_p5 = por %p603_p2, %p47_p13 }
  0x13   : > { %339 = dma.hbm_to_vmem [thread:$0]  (!%p337_p11), %s133_s23, 32, %s135_s26, [#allocation6]  }
  0x14   : > { %p638_p3 = por %p48_p0, %p47_p13  ;;  %s35_s3 = ssub.s32 %s543_s13, %s730_s27 }
  0x15   : > { %p349_p7 = scmp.lt.s32.totalorder %s547_s14, 2  ;;  %p38_p10 = scmp.eq.s32.totalorder %s35_s3, 0 }
  0x16   : > { %s145_s4 = sand.u32 1, %s535_s11   ;;  %s319_s7 = sshll.u32 %s543_s13, 1 }
  0x17   : > { %s318_s5 = sshll.u32 %s145_s4, 1  ;;  %s154_s16 = scalar_lea.hbm %s714_s0, %s319_s7 }
  0x18   : > { %s653_s6 = scalar_select %p38_p10, %s535_s11, %s40_s28  }
  0x19   : > { %s149_s21 = scalar_lea.vmem [#allocation2], %s318_s5  ;;  %s156_s18 = sshll.u32 %s154_s16, 4  ;;  %s157_s18 = int_to_ptr.hbm [resolvable:$true] %s156_s18 }
  0x1a   : > { %s158_s22 = sshll.u32 %s149_s21, 4  ;;  %p341_p2 = pnand %p349_p7, %p638_p3  ;;  %s159_s22 = int_to_ptr.vmem [resolvable:$true] %s158_s22 }
  0x1b   : > { %s146_s23 = scalar_lea.sflag [#allocation3], %s145_s4  ;;  %167 = sbr.rel (%p622_p8) target bundleno = 50 (0x32), region = 28 }
  0x1c   : > { %343 = dma.hbm_to_vmem [thread:$0]  (!%p341_p2), %s157_s18, 32, %s159_s22, %s146_s23  }
  0x1d   : > { %s664_s25 = sand.u32 (!%p622_p8), 1, %s531_s10  }
  0x1e   : > { %s321_s26 = sshll.u32 (!%p622_p8), %s664_s25, 1  ;;  %s170_s28 = scalar_lea.sflag (!%p622_p8), [#allocation3], %s664_s25 }
  0x1f   : > { %s173_s3 = scalar_lea.vmem (!%p622_p8), [#allocation2], %s321_s26 }
  0x20   : > { %514 = dma.done.wait (%p609_p4), %s170_s28, 32  }
  0x21   : > { %516 = vsyncadd (%p609_p4), %s170_s28, 4294967264 }
  0x22   : > { %518 = dma.done.wait (%p599_p1), [#allocation6], 32  }
  0x23   : > { %520 = vsyncadd (%p599_p1), [#allocation6], 4294967264  ;;  %s325_s24 = sshll.u32 %s539_s12, 1  ;;  %s199_s7 = scalar_lea.vmem [#allocation7], %s321_s26  ;;  %v200_v0 = vld [vmem:[%s173_s3] sm:$0x3] }
  0x24   : > { %s216_s5 = scalar_lea.hbm %s716_s2, %s325_s24  ;;  %s218_s8 = sshll.u32 %s199_s7, 4  ;;  %v201_v1 = vld [vmem:[#allocation5] sm:$0x3]  ;;  %s219_s8 = int_to_ptr.vmem [resolvable:$true] %s218_s8 }
  0x25   : > { %s220_s15 = sshll.u32 %s216_s5, 4  ;;  %v202_v2 = vadd.f32 %v201_v1, %v200_v0  ;;  %s205_s19 = scalar_lea.sflag [#allocation4], %s664_s25  ;;  %s221_s15 = int_to_ptr.hbm [resolvable:$true] %s220_s15 }
  0x26   : > { %s475_s17 = sshra.s32 %s221_s15, 4  ;;  %s481_s22 = scalar_lea.hbm %s716_s2, 4  ;;  %s476_s17 = int_to_ptr.hbm [resolvable:$true] %s475_s17 }
  0x27   : > { %203 = vst [vmem:[%s199_s7] sm:$0x3] %v202_v2  ;;  %s477_s16 = scalar_lea.hbm %s476_s17, 2  ;;  %p482_p11 = scmp.lt.s32.totalorder %s476_s17, %s716_s2 }
  0x28   : > { %p478_p1 = scmp.ne.s32.totalorder %s476_s17, %s477_s16  ;;  %p483_p12 = scmp.lt.s32.totalorder %s481_s22, %s477_s16 }
  0x2a   : > { %p479_p4 = pnand %p478_p1, %p644_p5  ;;  %p484_p13 = por %p483_p12, %p482_p11 }
  0x2c   : > { %p480_p8 = pneg %p479_p4 }
  0x2e   : > { %p485_p0 = pnand %p484_p13, %p480_p8 }
  0x30   : > { %488 = shalt.err (!%p485_p0)
}
  0x31   : > { %334 = dma.vmem_to_hbm [thread:$0]  (%p644_p5), %s219_s8, 32, %s221_s15, %s205_s19  }
  0x32 PF: > { %s232_s25 = sand.u32 1, %s527_s9   ;;  %p345_p3 = pnand %p317_p9, %p614_p6 }
  0x33   : > { %s233_s26 = scalar_lea.sflag [#allocation4], %s232_s25 }
  0x34   : > { %p346_p7 = pneg %p345_p3 }
  0x36   : > { %522 = dma.done.wait (%p346_p7), %s233_s26, 32  }
  0x37   : > { %524 = vsyncadd (%p346_p7), %s233_s26, 4294967264  ;;  %s19_s14 = sadd.s32 1, %s547_s14   ;;  %s724_s9 = smov %s531_s10 }
  0x38   : > { %p16_p10 = scmp.ge.s32.totalorder %s19_s14, 4   ;;  %s725_s10 = smov %s535_s11 }
  0x39   : > { %s726_s11 = smov %s653_s6  ;;  %s727_s12 = smov %s543_s13 }
  0x3a   : > { %s728_s13 = smov %s730_s27  ;;  %18 = sbr.rel (!%p16_p10) target bundleno = 7 (0x7), region = 78 }
  0x3f   :  { %239 = vsyncpa [#allocation3], 1 }
  0x40   :  { %241 = vsyncpa [#allocation3 + $0x1], 1 }
  0x41   :  { %242 = vsyncpa [#allocation6], 1 }
  0x42   :  { %243 = vsyncpa [#allocation4], 1 }
  0x43   :  { %245 = vsyncpa [#allocation4 + $0x1], 1 }

</bundles_post_ra>
